<compile_context>
chip_gen: v7x
topology: tpu7x:2x2x1
jax: 0.10.0
libtpu: 0.0.40
codegen_flags: <defaults>
</compile_context>

<pallas_src>
from functools import partial
from typing import List

import jax
import jax.numpy as jnp
from jax.experimental import pallas as pl
from jax.experimental.pallas import tpu as pltpu

BN_EPS = 1e-5
LANE = 128


def _round_up(n: int, m: int) -> int:
    return (n + m - 1) // m * m


def _mlp_kernel(*refs, num_hidden: int, use_bf16_matmul: bool):
    """Fused MLP forward on lane-dense (128-padded) feature dims.

    Ref order:
      x_ref,
      [w_ref, gamma_ref, beta_ref] * num_hidden,   (hidden Linear bias absorbed by BN)
      w_last_ref, b_last_ref,
      o_ref
    All tensors are small enough to live fully in VMEM, so the whole forward is
    one grid-less kernel invocation (training-mode BN needs global batch stats).
    """
    x_ref = refs[0]
    o_ref = refs[-1]
    param_refs = refs[1:-1]

    x = x_ref[...]  # (B, D0p) f32, lane-dense

    idx = 0
    for _ in range(num_hidden):
        w_ref, g_ref, be_ref = param_refs[idx:idx + 3]
        idx += 3

        if use_bf16_matmul:
            h = jnp.dot(x.astype(jnp.bfloat16), w_ref[...].astype(jnp.bfloat16),
                        preferred_element_type=jnp.float32)
        else:
            h = jnp.dot(x, w_ref[...], preferred_element_type=jnp.float32)

        # BatchNorm1d (training-mode stats, biased variance) folded into one
        # scale/shift FMA.  Linear bias cancels exactly under the mean subtraction.
        mean = jnp.mean(h, axis=0, keepdims=True)            # (1, Dp)  XLU reduce
        centered = h - mean
        var = jnp.mean(centered * centered, axis=0, keepdims=True)
        scale = g_ref[...] * jax.lax.rsqrt(var + BN_EPS)      # rsqrt -> EUP slot
        x = jnp.maximum(centered * scale + be_ref[...], 0.0)  # FMA + ReLU

    w_ref, b_ref = param_refs[idx:idx + 2]
    if use_bf16_matmul:
        out = jnp.dot(x.astype(jnp.bfloat16), w_ref[...].astype(jnp.bfloat16),
                      preferred_element_type=jnp.float32)
    else:
        out = jnp.dot(x, w_ref[...], preferred_element_type=jnp.float32)
    o_ref[...] = out + b_ref[...]                             # unmasked lane-dense store


def init_net_params(key, input_size: int, output_size: int, hidden_layer: List[int]):
    """PyTorch-default-like init (uniform +/- 1/sqrt(d_in)); unpadded shapes."""
    all_layers = [input_size, *hidden_layer, output_size]
    params = []
    for li, (d_in, d_out) in enumerate(zip(all_layers[:-1], all_layers[1:])):
        key, kw, kb = jax.random.split(key, 3)
        bound = 1.0 / jnp.sqrt(jnp.float32(d_in))
        w = jax.random.uniform(kw, (d_in, d_out), jnp.float32, -bound, bound)
        b = jax.random.uniform(kb, (1, d_out), jnp.float32, -bound, bound)
        if li < len(all_layers) - 2:
            gamma = jnp.ones((1, d_out), jnp.float32)
            beta = jnp.zeros((1, d_out), jnp.float32)
            params.extend([w, b, gamma, beta])
        else:
            params.extend([w, b])
    return params


def pad_net_params(params, dims):
    """Zero-pad params to lane-dense (multiple-of-128) feature dims for the kernel.

    Hidden-layer Linear biases are dropped: BatchNorm subtracts the batch mean,
    so a per-column constant bias cancels exactly.  Padded gamma/beta are zero,
    which keeps all padded lanes exactly zero through BN/ReLU.
    """
    pdims = [_round_up(d, LANE) for d in dims]
    num_hidden = len(dims) - 2
    padded = []
    idx = 0
    for li in range(num_hidden):
        d_in, d_out = dims[li], dims[li + 1]
        p_in, p_out = pdims[li], pdims[li + 1]
        w, _b, g, be = params[idx:idx + 4]
        idx += 4
        padded.append(jnp.pad(w, ((0, p_in - d_in), (0, p_out - d_out))))
        padded.append(jnp.pad(g, ((0, 0), (0, p_out - d_out))))
        padded.append(jnp.pad(be, ((0, 0), (0, p_out - d_out))))
    d_in, d_out = dims[-2], dims[-1]
    p_in, p_out = pdims[-2], pdims[-1]
    w, b = params[idx:idx + 2]
    padded.append(jnp.pad(w, ((0, p_in - d_in), (0, p_out - d_out))))
    padded.append(jnp.pad(b, ((0, 0), (0, p_out - d_out))))
    return padded, pdims


def net_forward(x, padded_params, dims, pdims, *, use_bf16_matmul: bool = False):
    batch = x.shape[0]
    num_hidden = len(dims) - 2
    input_size, output_size = dims[0], dims[-1]
    p_in, p_out = pdims[0], pdims[-1]

    x_pad = jnp.pad(x, ((0, 0), (0, p_in - input_size))) if p_in != input_size else x

    flops = 2 * batch * sum(a * b for a, b in zip(pdims[:-1], pdims[1:]))
    bytes_accessed = 4 * (batch * p_in + sum(int(p.size) for p in padded_params)
                          + batch * p_out)
    cost = pl.CostEstimate(flops=flops,
                           transcendentals=sum(pdims[1:-1]),
                           bytes_accessed=bytes_accessed)

    vmem_spec = pl.BlockSpec(memory_space=pltpu.MemorySpace.VMEM)
    kernel = partial(_mlp_kernel, num_hidden=num_hidden,
                     use_bf16_matmul=use_bf16_matmul)

    out_pad = pl.pallas_call(
        kernel,
        out_shape=jax.ShapeDtypeStruct((batch, p_out), jnp.float32),
        in_specs=[vmem_spec] * (1 + len(padded_params)),
        out_specs=vmem_spec,
        compiler_params=pltpu.CompilerParams(vmem_limit_bytes=32 * 1024 * 1024),
        cost_estimate=cost,
    )(x_pad, *padded_params)

    return out_pad[:, :output_size]


def net_forward_ref(x, params, num_hidden: int):
    """Plain-JAX reference with exact PyTorch forward semantics (unpadded)."""
    idx = 0
    h = x
    for _ in range(num_hidden):
        w, b, g, be = params[idx:idx + 4]
        idx += 4
        h = h @ w + b
        mean = jnp.mean(h, axis=0, keepdims=True)
        var = jnp.mean((h - mean) ** 2, axis=0, keepdims=True)
        h = jnp.maximum((h - mean) / jnp.sqrt(var + BN_EPS) * g + be, 0.0)
    w, b = params[idx:idx + 2]
    return h @ w + b


if __name__ == "__main__":
    # Shapes consistent with Net(_input_size=16, _output_size=4, _hidden_layer=[64])
    batch, input_size, output_size = 8, 16, 4
    hidden_layer = [64]
    dims = [input_size, *hidden_layer, output_size]

    key = jax.random.PRNGKey(0)
    kx, kp = jax.random.split(key)
    x = jax.random.normal(kx, (batch, input_size), jnp.float32)

    params = init_net_params(kp, input_size, output_size, hidden_layer)
    padded_params, pdims = pad_net_params(params, dims)

    out = net_forward(x, padded_params, dims, pdims, use_bf16_matmul=False)
    out = jax.block_until_ready(out)

    ref = net_forward_ref(x, params, num_hidden=len(hidden_layer))
    assert out.shape == (batch, output_size)
    assert jnp.allclose(out, ref, atol=1e-4, rtol=1e-4), "mismatch vs JAX reference"

    print("KERNEL_OK")
</pallas_src>

<mosaic_0001>
module attributes {stable_mosaic.version = 11 : i64} {
  func.func @_mlp_kernel(%arg0: memref<8x128xf32, #tpu.memory_space<vmem>>, %arg1: memref<128x128xf32, #tpu.memory_space<vmem>>, %arg2: memref<1x128xf32, #tpu.memory_space<vmem>>, %arg3: memref<1x128xf32, #tpu.memory_space<vmem>>, %arg4: memref<128x128xf32, #tpu.memory_space<vmem>>, %arg5: memref<1x128xf32, #tpu.memory_space<vmem>>, %arg6: memref<8x128xf32, #tpu.memory_space<vmem>>) attributes {dimension_semantics = [], scalar_prefetch = 0 : i64, scratch_operands = 0 : i64, tpu.core_type = #tpu.core_type<tc>} {
    %c0 = arith.constant 0 : index
    %c0_0 = arith.constant 0 : index
    %0 = vector.load %arg0[%c0, %c0_0] : memref<8x128xf32, #tpu.memory_space<vmem>>, vector<8x128xf32>
    %c0_1 = arith.constant 0 : index
    %c0_2 = arith.constant 0 : index
    %1 = vector.load %arg1[%c0_1, %c0_2] : memref<128x128xf32, #tpu.memory_space<vmem>>, vector<128x128xf32>
    %cst = arith.constant dense<0.000000e+00> : vector<8x128xf32>
    %2 = tpu.matmul %0, %1, %cst {dimension_numbers = #tpu.dot_dimension_numbers<[1], [0], [0], [1], [0, 0, 1, 1], [], []>} : vector<8x128xf32>, vector<128x128xf32>, vector<8x128xf32> -> vector<8x128xf32>
    %cst_3 = arith.constant dense<0.000000e+00> : vector<128xf32>
    %3 = vector.multi_reduction <add>, %2, %cst_3 [0] : vector<8x128xf32> to vector<128xf32>
    %4 = vector.shape_cast %3 : vector<128xf32> to vector<1x128xf32>
    %cst_4 = arith.constant 8.000000e+00 : f32
    %5 = vector.broadcast %cst_4 : f32 to vector<1x128xf32>
    %6 = arith.divf %4, %5 : vector<1x128xf32>
    %7 = vector.broadcast %6 : vector<1x128xf32> to vector<8x128xf32>
    %8 = arith.subf %2, %7 : vector<8x128xf32>
    %9 = arith.mulf %8, %8 : vector<8x128xf32>
    %cst_5 = arith.constant dense<0.000000e+00> : vector<128xf32>
    %10 = vector.multi_reduction <add>, %9, %cst_5 [0] : vector<8x128xf32> to vector<128xf32>
    %11 = vector.shape_cast %10 : vector<128xf32> to vector<1x128xf32>
    %cst_6 = arith.constant 8.000000e+00 : f32
    %12 = vector.broadcast %cst_6 : f32 to vector<1x128xf32>
    %13 = arith.divf %11, %12 : vector<1x128xf32>
    %c0_7 = arith.constant 0 : index
    %c0_8 = arith.constant 0 : index
    %14 = vector.load %arg2[%c0_7, %c0_8] : memref<1x128xf32, #tpu.memory_space<vmem>>, vector<1x128xf32>
    %cst_9 = arith.constant 9.99999974E-6 : f32
    %15 = vector.broadcast %cst_9 : f32 to vector<1x128xf32>
    %16 = arith.addf %13, %15 : vector<1x128xf32>
    %17 = math.rsqrt %16 : vector<1x128xf32>
    %18 = arith.mulf %14, %17 : vector<1x128xf32>
    %19 = vector.broadcast %18 : vector<1x128xf32> to vector<8x128xf32>
    %20 = arith.mulf %8, %19 : vector<8x128xf32>
    %c0_10 = arith.constant 0 : index
    %c0_11 = arith.constant 0 : index
    %21 = vector.load %arg3[%c0_10, %c0_11] : memref<1x128xf32, #tpu.memory_space<vmem>>, vector<1x128xf32>
    %22 = vector.broadcast %21 : vector<1x128xf32> to vector<8x128xf32>
    %23 = arith.addf %20, %22 : vector<8x128xf32>
    %cst_12 = arith.constant 0.000000e+00 : f32
    %24 = vector.broadcast %cst_12 : f32 to vector<8x128xf32>
    %25 = arith.maximumf %23, %24 : vector<8x128xf32>
    %c0_13 = arith.constant 0 : index
    %c0_14 = arith.constant 0 : index
    %26 = vector.load %arg4[%c0_13, %c0_14] : memref<128x128xf32, #tpu.memory_space<vmem>>, vector<128x128xf32>
    %cst_15 = arith.constant dense<0.000000e+00> : vector<8x128xf32>
    %27 = tpu.matmul %25, %26, %cst_15 {dimension_numbers = #tpu.dot_dimension_numbers<[1], [0], [0], [1], [0, 0, 1, 1], [], []>} : vector<8x128xf32>, vector<128x128xf32>, vector<8x128xf32> -> vector<8x128xf32>
    %c0_16 = arith.constant 0 : index
    %c0_17 = arith.constant 0 : index
    %28 = vector.load %arg5[%c0_16, %c0_17] : memref<1x128xf32, #tpu.memory_space<vmem>>, vector<1x128xf32>
    %29 = vector.broadcast %28 : vector<1x128xf32> to vector<8x128xf32>
    %30 = arith.addf %27, %29 : vector<8x128xf32>
    %c0_18 = arith.constant 0 : index
    %c0_19 = arith.constant 0 : index
    %31 = vector.load %arg6[%c0_18, %c0_19] : memref<8x128xf32, #tpu.memory_space<vmem>>, vector<8x128xf32>
    tpu.vector_store %arg6[%c0_18, %c0_19], %30 {strides = array<i32>} : memref<8x128xf32, #tpu.memory_space<vmem>>, vector<8x128xf32>,
    return
  }
}

</mosaic_0001>

<bundles_post_ra>
// kernel: tpu_custom_call.1
= control target key start
LH: loop header
LB: loop body
LE: loop exit
PB: predicated region body
PF: predicated region fallthrough
CT: control target
= control target key end

     0   :  { %11 = vsyncpa [#allocation3], 0  ;;  %s679_s0 = inlined_call_operand.hbm [shape: f32[8,128], index: 0, kind: input, shape index: {}]   ;;  %s680_s1 = inlined_call_operand.hbm [shape: f32[128,128], index: 1, kind: input, shape index: {}]   ;;  %s681_s2 = inlined_call_operand.vmem [shape: f32[1,128], index: 2, kind: input, shape index: {}]   ;;  %s682_s3 = inlined_call_operand.vmem [shape: f32[1,128], index: 3, kind: input, shape index: {}]   ;;  %s683_s4 = inlined_call_operand.hbm [shape: f32[128,128], index: 4, kind: input, shape index: {}]   ;;  %s684_s5 = inlined_call_operand.vmem [shape: f32[1,128], index: 5, kind: input, shape index: {}]   ;;  %s685_s6 = inlined_call_operand.hbm [shape: f32[8,128], index: 6, kind: output, shape index: {}]  }
   0x1   :  { %12 = vsyncpa [#allocation6], 0 }
   0x2   :  { %13 = vsyncpa [#allocation4], 0  ;;  %s556_s21 = smov [#allocation5]   ;;  %s462_s25 = scalar_lea.hbm %s680_s1, 2048 }
   0x3   :  { %s29_s22 = sshll.u32 %s556_s21, 4  ;;  %p463_p0 = scmp.ne.s32.totalorder %s680_s1, %s462_s25  ;;  %s30_s22 = int_to_ptr.vmem [resolvable:$true] %s29_s22 }
   0x4   :  { %p466_p1 = scmp.lt.u32.totalorder %s462_s25, %s680_s1 }
   0x6   :  { %p468_p2 = pnand %p466_p1, %p463_p0 }
   0x8   :  { %471 = shalt.err (!%p468_p2)
}
   0x9   :  { %s472_s30 = scalar_lea.vmem %s30_s22, 2048  ;;  %p477_p4 = scmp.lt.s32.totalorder %s30_s22, %s30_s22 }
   0xa   :  { %p473_p3 = scmp.ne.s32.totalorder %s30_s22, %s472_s30  ;;  %p478_p5 = scmp.lt.s32.totalorder %s472_s30, %s472_s30 }
   0xc   :  { %p479_p6 = por %p478_p5, %p477_p4 }
   0xe   :  { %p480_p7 = pnand %p479_p6, %p473_p3 }
  0x10   :  { %483 = shalt.err (!%p480_p7)
}
  0x11   :  { %s557_s7 = smov 128   ;;  %s558_s8 = smov 8  }
  0x12   :  { %35 = dma.hbm_to_vmem [thread:$0]  %s680_s1, 2048, %s30_s22, [#allocation6], %s557_s7, %s557_s7, %s558_s8  }
  0x13   :  { %s559_s11 = smov [#allocation2]   ;;  %s560_s13 = smov [#allocation7]  }
  0x14   :  { %s20_s12 = sshll.u32 %s559_s11, 4  ;;  %s45_s14 = sshll.u32 %s560_s13, 4  ;;  %s21_s12 = int_to_ptr.vmem [resolvable:$true] %s20_s12  ;;  %s46_s14 = int_to_ptr.vmem [resolvable:$true] %s45_s14 }
  0x15   :  { %s484_s17 = scalar_lea.hbm %s679_s0, 128 }
  0x16   :  { %p485_p8 = scmp.ne.s32.totalorder %s679_s0, %s484_s17  ;;  %p488_p9 = scmp.lt.u32.totalorder %s484_s17, %s679_s0 }
  0x18   :  { %p490_p10 = pnand %p488_p9, %p485_p8 }
  0x1a   :  { %493 = shalt.err (!%p490_p10)
}
  0x1b   :  { %s494_s1 = scalar_lea.vmem %s21_s12, 128  ;;  %p499_p12 = scmp.lt.s32.totalorder %s21_s12, %s21_s12 }
  0x1c   :  { %p495_p11 = scmp.ne.s32.totalorder %s21_s12, %s494_s1  ;;  %p500_p13 = scmp.lt.s32.totalorder %s494_s1, %s494_s1 }
  0x1e   :  { %p501_p0 = por %p500_p13, %p499_p12 }
  0x20   :  { %p502_p1 = pnand %p501_p0, %p495_p11 }
  0x22   :  { %505 = shalt.err (!%p502_p1)
}
  0x23   :  { %23 = dma.hbm_to_vmem [thread:$0]  %s679_s0, 128, %s21_s12, [#allocation3]  }
  0x24   :  { %s506_s26 = scalar_lea.hbm %s683_s4, 2048 }
  0x25   :  { %p507_p2 = scmp.ne.s32.totalorder %s683_s4, %s506_s26  ;;  %p510_p3 = scmp.lt.u32.totalorder %s506_s26, %s683_s4 }
  0x27   :  { %p512_p4 = pnand %p510_p3, %p507_p2 }
  0x29   :  { %515 = shalt.err (!%p512_p4)
}
  0x2a   :  { %s516_s9 = scalar_lea.vmem %s46_s14, 2048  ;;  %p521_p6 = scmp.lt.s32.totalorder %s46_s14, %s46_s14 }
  0x2b   :  { %p517_p5 = scmp.ne.s32.totalorder %s46_s14, %s516_s9  ;;  %p522_p7 = scmp.lt.s32.totalorder %s516_s9, %s516_s9 }
  0x2d   :  { %p523_p8 = por %p522_p7, %p521_p6 }
  0x2f   :  { %p524_p9 = pnand %p523_p8, %p517_p5 }
  0x31   :  { %527 = shalt.err (!%p524_p9)
}
  0x32   :  { %51 = dma.hbm_to_vmem [thread:$0]  %s683_s4, 2048, %s46_s14, [#allocation6], %s557_s7, %s557_s7, %s558_s8  }
  0x33   :  { %550 = dma.done.wait [#allocation3], 128  }
  0x34   :  { %551 = vsyncadd [#allocation3], 4294967168 }
  0x35   :  { %552 = dma.done.wait [#allocation6], 4096  }
  0x36   :  { %553 = vsyncadd [#allocation6], 4294963200  ;;  %v561_v0 = vmov 0.0|0.0   ;;  %vm562_vm0 = vmmov 0   ;;  %v563_v1 = vmov 0.0   ;;  %v64_v2 = vld [vmem:[#allocation5] sm:$0xff] }
  0x37   :  { %403 = vmatprep.subr.bf16.mxu0 %v561_v0  ;;  %365 = vmatprep.mubr.msk.f32.mxu0 %vm562_vm0, %v563_v1  ;;  %v65_v3 = vld [vmem:[#allocation5 + $0x8] sm:$0xff]  ;;  %v66_v4 = vld [vmem:[#allocation5 + $0x10] sm:$0xff]  ;;  %v67_v6 = vld [vmem:[#allocation5 + $0x18] sm:$0xff]  ;;  %s564_s14 = smov [#allocation8]  }
  0x38   :  { %427 = vmatprep.subr.bf16.mxu1 %v561_v0  ;;  %400 = vmatprep.mubr.msk.f32.mxu1 %vm562_vm0, %v563_v1  ;;  %v404_v5 = vpack.c.bf16 %v65_v3, %v64_v2  ;;  %v407_v7 = vpack.c.bf16 %v67_v6, %v66_v4  ;;  %v68_v8 = vld [vmem:[#allocation5 + $0x20] sm:$0xff]  ;;  %v69_v9 = vld [vmem:[#allocation5 + $0x28] sm:$0xff]  ;;  %v70_v11 = vld [vmem:[#allocation5 + $0x30] sm:$0xff]  ;;  %v172_v6 = vlaneseq  ;;  %s287_s15 = sshll.u32 %s564_s14, 4  ;;  %s288_s15 = int_to_ptr.vmem [resolvable:$true] %s287_s15 }
  0x39   :  { %v410_v10 = vpack.c.bf16 %v69_v9, %v68_v8  ;;  %v71_v12 = vld [vmem:[#allocation5 + $0x38] sm:$0xff]  ;;  %v72_v14 = vld [vmem:[#allocation5 + $0x40] sm:$0xff]  ;;  %v73_v15 = vld [vmem:[#allocation5 + $0x48] sm:$0xff]  ;;  %p533_p11 = scmp.lt.s32.totalorder %s288_s15, %s288_s15 }
  0x3a   :  { %405 = vmatpush3.bf16.msra.mxu0 %v404_v5  ;;  %v413_v13 = vpack.c.bf16 %v71_v12, %v70_v11  ;;  %v416_v16 = vpack.c.bf16 %v73_v15, %v72_v14  ;;  %v74_v17 = vld [vmem:[#allocation5 + $0x50] sm:$0xff]  ;;  %v75_v18 = vld [vmem:[#allocation5 + $0x58] sm:$0xff]  ;;  %v76_v20 = vld [vmem:[#allocation5 + $0x60] sm:$0xff] }
  0x3b   :  { %406 = vmatprep.subr.bf16.mxu0 %v561_v0  ;;  %v419_v19 = vpack.c.bf16 %v75_v18, %v74_v17  ;;  %v77_v21 = vld [vmem:[#allocation5 + $0x68] sm:$0xff]  ;;  %v78_v23 = vld [vmem:[#allocation5 + $0x70] sm:$0xff]  ;;  %v79_v24 = vld [vmem:[#allocation5 + $0x78] sm:$0xff] }
  0x3c   :  { %v422_v22 = vpack.c.bf16 %v77_v21, %v76_v20  ;;  %v425_v25 = vpack.c.bf16 %v79_v24, %v78_v23  ;;  %v63_v26 = vld [vmem:[#allocation2] sm:$0xff]  ;;  %v187_v27 = vld [vmem:[#allocation7] sm:$0xff]  ;;  %v188_v28 = vld [vmem:[#allocation7 + $0x8] sm:$0xff] }
  0x3d   :  { %v428_v29 = vpack.c.bf16 %v188_v28, %v187_v27  ;;  %v189_v30 = vld [vmem:[#allocation7 + $0x10] sm:$0xff]  ;;  %v190_v31 = vld [vmem:[#allocation7 + $0x18] sm:$0xff]  ;;  %v191_v33 = vld [vmem:[#allocation7 + $0x20] sm:$0xff] }
  0x3e   :  { %408 = vmatpush3.bf16.msra.mxu0 %v407_v7  ;;  %v431_v32 = vpack.c.bf16 %v190_v31, %v189_v30  ;;  %v192_v34 = vld [vmem:[#allocation7 + $0x28] sm:$0xff]  ;;  %v193_v36 = vld [vmem:[#allocation7 + $0x30] sm:$0xff]  ;;  %v194_v37 = vld [vmem:[#allocation7 + $0x38] sm:$0xff]  ;;  %v173_v7 = vshrl.u32 %v172_v6, 7 }
  0x3f   :  { %409 = vmatprep.subr.bf16.mxu0 %v561_v0  ;;  %429 = vmatpush3.bf16.msra.mxu1 %v428_v29  ;;  %v434_v35 = vpack.c.bf16 %v192_v34, %v191_v33  ;;  %v437_v38 = vpack.c.bf16 %v194_v37, %v193_v36  ;;  %v195_v39 = vld [vmem:[#allocation7 + $0x40] sm:$0xff]  ;;  %v196_v40 = vld [vmem:[#allocation7 + $0x48] sm:$0xff]  ;;  %v197_v42 = vld [vmem:[#allocation7 + $0x50] sm:$0xff] }
  0x40   :  { %430 = vmatprep.subr.bf16.mxu1 %v561_v0  ;;  %v440_v41 = vpack.c.bf16 %v196_v40, %v195_v39  ;;  %v198_v43 = vld [vmem:[#allocation7 + $0x58] sm:$0xff]  ;;  %v199_v45 = vld [vmem:[#allocation7 + $0x60] sm:$0xff]  ;;  %v200_v46 = vld [vmem:[#allocation7 + $0x68] sm:$0xff]  ;;  %v174_v9 = vsub.s32 0, %v173_v7 }
  0x41   :  { %v443_v44 = vpack.c.bf16 %v198_v43, %v197_v42  ;;  %v446_v47 = vpack.c.bf16 %v200_v46, %v199_v45  ;;  %v201_v48 = vld [vmem:[#allocation7 + $0x70] sm:$0xff]  ;;  %v202_v49 = vld [vmem:[#allocation7 + $0x78] sm:$0xff] }
  0x42   :  { %411 = vmatpush3.bf16.msra.mxu0 %v410_v10  ;;  %v449_v50 = vpack.c.bf16 %v202_v49, %v201_v48  ;;  %v167_v8 = vld [vmem:[%s681_s2] sm:$0x1]  ;;  %s528_s2 = scalar_lea.vmem %s288_s15, 128 }
  0x43   :  { %412 = vmatprep.subr.bf16.mxu0 %v561_v0  ;;  %432 = vmatpush3.bf16.msra.mxu1 %v431_v32  ;;  %v298_v17 = vld [vmem:[%s684_s5] ss:$0 sm:$0xff]  ;;  %p529_p10 = scmp.ne.s32.totalorder %s288_s15, %s528_s2  ;;  %p534_p12 = scmp.lt.s32.totalorder %s528_s2, %s528_s2 }
  0x44   :  { %433 = vmatprep.subr.bf16.mxu1 %v561_v0 }
  0x45   :  { %p535_p13 = por %p534_p12, %p533_p11 }
  0x46   :  { %414 = vmatpush3.bf16.msra.mxu0 %v413_v13  ;;  %v297_v13 = vld [vmem:[%s682_s3] ss:$0 sm:$0xff] }
  0x47   :  { %415 = vmatprep.subr.bf16.mxu0 %v561_v0  ;;  %435 = vmatpush3.bf16.msra.mxu1 %v434_v35  ;;  %p536_p0 = pnand %p535_p13, %p529_p10 }
  0x48   :  { %436 = vmatprep.subr.bf16.mxu1 %v561_v0 }
  0x4a   :  { %417 = vmatpush3.bf16.msra.mxu0 %v416_v16 }
  0x4b   :  { %418 = vmatprep.subr.bf16.mxu0 %v561_v0  ;;  %438 = vmatpush3.bf16.msra.mxu1 %v437_v38 }
  0x4c   :  { %439 = vmatprep.subr.bf16.mxu1 %v561_v0 }
  0x4e   :  { %420 = vmatpush3.bf16.msra.mxu0 %v419_v19 }
  0x4f   :  { %421 = vmatprep.subr.bf16.mxu0 %v561_v0  ;;  %441 = vmatpush3.bf16.msra.mxu1 %v440_v41 }
  0x50   :  { %442 = vmatprep.subr.bf16.mxu1 %v561_v0 }
  0x52   :  { %423 = vmatpush3.bf16.msra.mxu0 %v422_v22 }
  0x53   :  { %424 = vmatprep.subr.bf16.mxu0 %v561_v0  ;;  %444 = vmatpush3.bf16.msra.mxu1 %v443_v44 }
  0x54   :  { %445 = vmatprep.subr.bf16.mxu1 %v561_v0 }
  0x56   :  { %426 = vmatpush3.bf16.msra.mxu0 %v425_v25 }
  0x57   :  { %447 = vmatpush3.bf16.msra.mxu1 %v446_v47 }
  0x58   :  { %448 = vmatprep.subr.bf16.mxu1 %v561_v0 }
  0x59   :  { %366 = vmatmul.mubr.f32.vlgmr.msra.gmra.mrb[0].mxu0 %v63_v26 }
  0x5b   :  { %450 = vmatpush3.bf16.msra.mxu1 %v449_v50 }
 0x12c   :  { %v146_v51 = vpop.f32.mrb[0].mxu0 }
 0x12d   :  { %v150_v52 = vrot.slane %v146_v51, 4  ;;  %v367_v53 = vpop.f32.mrb[1].mxu0 }
 0x12f   :  { %v151_v54 = vadd.f32 %v150_v52, %v146_v51 }
 0x131   :  { %v152_v55 = vrot.slane %v151_v54, 2 }
 0x133   :  { %v153_v56 = vadd.f32 %v152_v55, %v151_v54 }
 0x135   :  { %v154_v57 = vrot.slane %v153_v56, 1 }
 0x137   :  { %v155_v58 = vadd.f32 %v154_v57, %v153_v56 }
 0x139   :  { %v157_v59 = vmul.f32 0.125, %v155_v58 }
 0x13b   :  { %v158_v60 = vsub.f32 %v146_v51, %v157_v59 }
 0x13d   :  { %v159_v61 = vmul.f32 %v158_v60, %v158_v60 }
 0x13f   :  { %v160_v62 = vrot.slane %v159_v61, 4 }
 0x141   :  { %v161_v63 = vadd.f32 %v160_v62, %v159_v61 }
 0x143   :  { %v162_v1 = vrot.slane %v161_v63, 2 }
 0x145   :  { %v163_v2 = vadd.f32 %v162_v1, %v161_v63 }
 0x147   :  { %v164_v0 = vrot.slane %v163_v2, 1 }
 0x149   :  { %v165_v3 = vadd.f32 %v164_v0, %v163_v2 }
 0x14b   :  { %v166_v4 = vmul.f32 0.125, %v165_v3 }
 0x14d   :  { %v168_v5 = vadd.f32 1e-05, %v166_v4 }
 0x14f   :  { %460 = vrsqrt.f32 %v168_v5 }
 0x159   :  { %v461_v10 = vpop.eup %460 }
 0x15a   :  { %v170_v11 = vmul.f32 %v461_v10, %v167_v8 }
 0x15c   :  { %v175_v12 = vrot.slane %v170_v11, %v174_v9 }
 0x15e   :  { %v177_v14 = vmul.f32 %v175_v12, %v158_v60 }
 0x160   :  { %v185_v15 = vadd.f32 %v297_v13, %v177_v14 }
 0x162   :  { %v186_v16 = vmax.f32 %v185_v15, 0.0 }
 0x164   :  { %401 = vmatmul.mubr.f32.vlgmr.msra.gmra.mrb[0].mxu1 %v186_v16 }
 0x237   :  { %v276_v18 = vpop.f32.mrb[0].mxu1 }
 0x238   :  { %v277_v19 = vadd.f32 %v298_v17, %v276_v18  ;;  %v402_v20 = vpop.f32.mrb[1].mxu1 }
 0x23a   :  { %280 = vst [vmem:[#allocation8] sm:$0xff] %v277_v19 }
 0x23b   :  { %539 = shalt.err (!%p536_p0)
}
 0x23c   :  { %s540_s17 = scalar_lea.hbm %s685_s6, 128 }
 0x23d   :  { %p541_p1 = scmp.ne.s32.totalorder %s685_s6, %s540_s17  ;;  %p544_p2 = scmp.lt.u32.totalorder %s540_s17, %s685_s6 }
 0x23f   :  { %p546_p3 = pnand %p544_p2, %p541_p1 }
 0x241   :  { %549 = shalt.err (!%p546_p3)
}
 0x242   :  { %290 = dma.vmem_to_hbm [thread:$0]  %s288_s15, 128, %s685_s6, [#allocation4]  }
 0x243   :  { %554 = dma.done.wait [#allocation4], 128  }
 0x244   :  { %555 = vsyncadd [#allocation4], 4294967168 }
 0x245   :  { %294 = vsyncpa [#allocation3], 1 }
 0x246   :  { %295 = vsyncpa [#allocation6], 1 }
 0x247   :  { %296 = vsyncpa [#allocation4], 1 }

</bundles_post_ra>
